<compile_context>
chip_gen: v7x
topology: tpu7x:2x2x1
jax: 0.10.0
libtpu: 0.0.40
codegen_flags: <defaults>
</compile_context>

<pallas_src>
import functools

import jax
import jax.numpy as jnp
from jax import lax
from jax.experimental import pallas as pl
from jax.experimental.pallas import tpu as pltpu

LANES = 128
SUBLANES = 8


def _min_sublanes(dtype):
    """Minimum row granularity so a (rows, 128) block is layout-legal."""
    itemsize = jnp.dtype(dtype).itemsize
    return SUBLANES * max(4 // itemsize, 1)   # f32->8, bf16->16, int8/fp8->32


def _rmse_kernel(yp_ref, y_ref, o_ref, *, rows, row_tile, steps_per_core, chunk):
    """Grid = (shard, step). o_ref is the per-shard (8,128) f32 SSE accumulator."""
    c = pl.program_id(0)          # shard / TensorCore ("parallel")
    i = pl.program_id(1)          # row-tile step within shard ("arbitrary")

    @pl.when(i == 0)
    def _():
        o_ref[...] = jnp.zeros_like(o_ref)

    g = c * steps_per_core + i    # global row-tile index
    row_start = g * row_tile
    valid = rows - row_start      # real rows in this tile (may be <=0 or >=row_tile)

    nchunks = row_tile // chunk   # static
    unroll = min(8, nchunks)

    def fold(sq):                 # (chunk,128) f32 -> (8,128) f32, pure VPU adds
        if chunk == SUBLANES:
            return sq
        return sq.reshape(chunk // SUBLANES, SUBLANES, LANES).sum(axis=0)

    @pl.when(valid >= row_tile)   # hot path: full tile, no masking, vreg accumulator
    def _():
        def body(j, acc):
            r = pl.multiple_of(j * chunk, chunk)
            d = (yp_ref[pl.ds(r, chunk), :].astype(jnp.float32)
                 - y_ref[pl.ds(r, chunk), :].astype(jnp.float32))
            return acc + fold(d * d)
        acc = lax.fori_loop(0, nchunks, body,
                            jnp.zeros((SUBLANES, LANES), jnp.float32),
                            unroll=unroll)
        o_ref[...] += acc

    @pl.when(valid < row_tile)    # cold path: ragged or empty tile (<= once per shard)
    def _():
        def body(j, acc):
            r = pl.multiple_of(j * chunk, chunk)
            d = (yp_ref[pl.ds(r, chunk), :].astype(jnp.float32)
                 - y_ref[pl.ds(r, chunk), :].astype(jnp.float32))
            ridx = lax.broadcasted_iota(jnp.int32, (chunk, LANES), 0)
            sq = jnp.where(ridx < (valid - r), d * d, 0.0)
            return acc + fold(sq)
        acc = lax.fori_loop(0, nchunks, body,
                            jnp.zeros((SUBLANES, LANES), jnp.float32))
        o_ref[...] += acc


def rmse_loss(ypred, y, eps=1e-6, row_tile=None, num_shards=2):
    assert ypred.shape == y.shape, "ypred and y must have identical shapes"
    n_elems = ypred.size
    assert n_elems > 0

    yp_flat = jnp.ravel(ypred)
    y_flat = jnp.ravel(y)

    sub_min = max(_min_sublanes(ypred.dtype), _min_sublanes(y.dtype))
    if row_tile is None:
        max_item = max(jnp.dtype(ypred.dtype).itemsize, jnp.dtype(y.dtype).itemsize)
        row_tile = 4096 * max(4 // max_item, 1)   # ~2 MiB per input block

    # Aligned prefix for the kernel; tiny ragged tail handled with plain jnp
    # (no full-array jnp.pad copies in HBM).
    pad_to = sub_min * LANES
    main = (n_elems // pad_to) * pad_to

    tail_sse = jnp.float32(0.0)
    if main < n_elems:
        dt = yp_flat[main:].astype(jnp.float32) - y_flat[main:].astype(jnp.float32)
        tail_sse = jnp.sum(dt * dt)

    if main == 0:
        # Input smaller than one layout-legal row group: nothing for the kernel.
        return jnp.sqrt(tail_sse / jnp.float32(n_elems) + jnp.float32(eps))

    if main == n_elems:
        yp_main, y_main = yp_flat, y_flat          # zero-copy (free reshape below)
    else:
        yp_main, y_main = yp_flat[:main], y_flat[:main]

    rows = main // LANES
    yp2d = yp_main.reshape(rows, LANES)
    y2d = y_main.reshape(rows, LANES)

    # Big, layout-legal tiles for the HBM-bound streaming loop.
    row_tile = min(int(row_tile), rows)
    row_tile = max((row_tile // sub_min) * sub_min, sub_min)
    chunk = sub_min

    num_shards = max(int(num_shards), 1)
    total_steps = pl.cdiv(rows, row_tile)
    steps_per_core = pl.cdiv(total_steps, num_shards)
    last_step = total_steps - 1

    # Clamp the global block index; over-range shards are fully masked in-kernel.
    in_map = lambda c, i: (jnp.minimum(c * steps_per_core + i, last_step), 0)

    kernel = functools.partial(_rmse_kernel, rows=rows, row_tile=row_tile,
                               steps_per_core=steps_per_core, chunk=chunk)

    in_bytes = (jnp.dtype(ypred.dtype).itemsize + jnp.dtype(y.dtype).itemsize)
    block_bytes = row_tile * LANES * in_bytes                  # both inputs, 1 buffer
    vmem_limit = int(min(max(2 * block_bytes + (4 << 20), 16 << 20), 32 << 20))

    partials = pl.pallas_call(
        kernel,
        out_shape=jax.ShapeDtypeStruct((num_shards * SUBLANES, LANES), jnp.float32),
        grid_spec=pltpu.PrefetchScalarGridSpec(
            num_scalar_prefetch=0,
            grid=(num_shards, steps_per_core),
            in_specs=[
                pl.BlockSpec((row_tile, LANES), in_map),
                pl.BlockSpec((row_tile, LANES), in_map),
            ],
            out_specs=pl.BlockSpec((SUBLANES, LANES), lambda c, i: (c, 0)),
        ),
        compiler_params=pltpu.CompilerParams(
            dimension_semantics=("parallel", "arbitrary"),
            vmem_limit_bytes=vmem_limit,
        ),
        cost_estimate=pl.CostEstimate(
            flops=3 * main, transcendentals=0,
            bytes_accessed=main * in_bytes + num_shards * SUBLANES * LANES * 4),
    )(yp2d, y2d)

    sse = jnp.sum(partials) + tail_sse
    mse = sse / jnp.float32(n_elems)
    return jnp.sqrt(mse + jnp.float32(eps))   # scalar, matching torch's 0-dim loss


if __name__ == "__main__":
    key = jax.random.PRNGKey(0)
    k1, k2, k3, k4 = jax.random.split(key, 4)

    # Shapes consistent with a typical NCHW prediction/target pair.
    ypred = jax.random.normal(k1, (2, 4, 16, 16), dtype=jnp.float32)
    y = jax.random.normal(k2, (2, 4, 16, 16), dtype=jnp.float32)

    loss = rmse_loss(ypred, y)
    jax.block_until_ready(loss)
    ref = jnp.sqrt(jnp.mean((ypred - y) ** 2) + 1e-6)
    assert jnp.allclose(loss, ref, rtol=1e-5, atol=1e-6), (loss, ref)

    # Secondary check: non-128-aligned size exercising the jnp tail path plus
    # the in-kernel ragged-tile cold path (rows=24, row_tile=16 -> partial block).
    yp2 = jax.random.normal(k3, (7, 555), dtype=jnp.float32)
    y2 = jax.random.normal(k4, (7, 555), dtype=jnp.float32)
    loss2 = rmse_loss(yp2, y2, row_tile=16)
    jax.block_until_ready(loss2)
    ref2 = jnp.sqrt(jnp.mean((yp2 - y2) ** 2) + 1e-6)
    assert jnp.allclose(loss2, ref2, rtol=1e-5, atol=1e-6), (loss2, ref2)

    print("KERNEL_OK")
</pallas_src>

<mosaic_0001>
module attributes {stable_mosaic.version = 11 : i64} {
  func.func @_rmse_kernel(%arg0: i32, %arg1: i32, %arg2: memref<16x128xf32, #tpu.memory_space<vmem>>, %arg3: memref<16x128xf32, #tpu.memory_space<vmem>>, %arg4: memref<8x128xf32, #tpu.memory_space<vmem>>) attributes {dimension_semantics = [#tpu.dimension_semantics<parallel>, #tpu.dimension_semantics<arbitrary>], iteration_bounds = array<i64: 2, 1>, scalar_prefetch = 0 : i64, scratch_operands = 0 : i64, tpu.core_type = #tpu.core_type<tc>, window_params = [{transform_indices = @transform_0, window_bounds = array<i64: 16, 128>}, {transform_indices = @transform_1, window_bounds = array<i64: 16, 128>}, {transform_indices = @transform_2, window_bounds = array<i64: 8, 128>}]} {
    %c0_i32 = arith.constant 0 : i32
    %0 = arith.cmpi eq, %arg1, %c0_i32 : i32
    %1 = arith.extui %0 : i1 to i32
    %c0_i32_0 = arith.constant 0 : i32
    %2 = arith.cmpi ne, %1, %c0_i32_0 : i32
    scf.if %2 {
      %cst = arith.constant 0.000000e+00 : f32
      %13 = vector.broadcast %cst : f32 to vector<8x128xf32>
      %c0 = arith.constant 0 : index
      %c0_6 = arith.constant 0 : index
      %14 = vector.load %arg4[%c0, %c0_6] : memref<8x128xf32, #tpu.memory_space<vmem>>, vector<8x128xf32>
      tpu.vector_store %arg4[%c0, %c0_6], %13 {strides = array<i32>} : memref<8x128xf32, #tpu.memory_space<vmem>>, vector<8x128xf32>,
    } else {
    }
    %c1_i32 = arith.constant 1 : i32
    %3 = arith.muli %arg0, %c1_i32 : i32
    %4 = arith.addi %3, %arg1 : i32
    %c16_i32 = arith.constant 16 : i32
    %5 = arith.muli %4, %c16_i32 : i32
    %c16_i32_1 = arith.constant 16 : i32
    %6 = arith.subi %c16_i32_1, %5 : i32
    %c16_i32_2 = arith.constant 16 : i32
    %7 = arith.cmpi sge, %6, %c16_i32_2 : i32
    %8 = arith.extui %7 : i1 to i32
    %c0_i32_3 = arith.constant 0 : i32
    %9 = arith.cmpi ne, %8, %c0_i32_3 : i32
    scf.if %9 {
      %cst = arith.constant 0.000000e+00 : f32
      %13 = vector.broadcast %cst : f32 to vector<8x128xf32>
      %c0_i32_6 = arith.constant 0 : i32
      %c8_i32 = arith.constant 8 : i32
      %14 = arith.muli %c0_i32_6, %c8_i32 : i32
      %15 = tpu.assume_multiple %14, 8 : i32
      %16 = arith.index_cast %15 : i32 to index
      %c0 = arith.constant 0 : index
      %17 = vector.load %arg2[%16, %c0] : memref<16x128xf32, #tpu.memory_space<vmem>>, vector<8x128xf32>
      %18 = arith.index_cast %15 : i32 to index
      %c0_7 = arith.constant 0 : index
      %19 = vector.load %arg3[%18, %c0_7] : memref<16x128xf32, #tpu.memory_space<vmem>>, vector<8x128xf32>
      %20 = arith.subf %17, %19 : vector<8x128xf32>
      %21 = arith.mulf %20, %20 : vector<8x128xf32>
      %22 = arith.addf %13, %21 : vector<8x128xf32>
      %c1_i32_8 = arith.constant 1 : i32
      %c8_i32_9 = arith.constant 8 : i32
      %23 = arith.muli %c1_i32_8, %c8_i32_9 : i32
      %24 = tpu.assume_multiple %23, 8 : i32
      %25 = arith.index_cast %24 : i32 to index
      %c0_10 = arith.constant 0 : index
      %26 = vector.load %arg2[%25, %c0_10] : memref<16x128xf32, #tpu.memory_space<vmem>>, vector<8x128xf32>
      %27 = arith.index_cast %24 : i32 to index
      %c0_11 = arith.constant 0 : index
      %28 = vector.load %arg3[%27, %c0_11] : memref<16x128xf32, #tpu.memory_space<vmem>>, vector<8x128xf32>
      %29 = arith.subf %26, %28 : vector<8x128xf32>
      %30 = arith.mulf %29, %29 : vector<8x128xf32>
      %31 = arith.addf %22, %30 : vector<8x128xf32>
      %c2_i32 = arith.constant 2 : i32
      %c0_12 = arith.constant 0 : index
      %c0_13 = arith.constant 0 : index
      %32 = vector.load %arg4[%c0_12, %c0_13] : memref<8x128xf32, #tpu.memory_space<vmem>>, vector<8x128xf32>
      %33 = arith.addf %32, %31 : vector<8x128xf32>
      %c0_14 = arith.constant 0 : index
      %c0_15 = arith.constant 0 : index
      %34 = vector.load %arg4[%c0_14, %c0_15] : memref<8x128xf32, #tpu.memory_space<vmem>>, vector<8x128xf32>
      tpu.vector_store %arg4[%c0_14, %c0_15], %33 {strides = array<i32>} : memref<8x128xf32, #tpu.memory_space<vmem>>, vector<8x128xf32>,
    } else {
    }
    %c16_i32_4 = arith.constant 16 : i32
    %10 = arith.cmpi slt, %6, %c16_i32_4 : i32
    %11 = arith.extui %10 : i1 to i32
    %c0_i32_5 = arith.constant 0 : i32
    %12 = arith.cmpi ne, %11, %c0_i32_5 : i32
    scf.if %12 {
      %cst = arith.constant 0.000000e+00 : f32
      %13 = vector.broadcast %cst : f32 to vector<8x128xf32>
      %c0_i32_6 = arith.constant 0 : i32
      %c2_i32 = arith.constant 2 : i32
      %14 = arith.addi %c0_i32_6, %c2_i32 : i32
      %c1_i32_7 = arith.constant 1 : i32
      %15 = scf.for %arg5 = %c0_i32_6 to %14 step %c1_i32_7 iter_args(%arg6 = %13) -> (vector<8x128xf32>)  : i32 {
        %c8_i32 = arith.constant 8 : i32
        %19 = arith.muli %arg5, %c8_i32 : i32
        %20 = tpu.assume_multiple %19, 8 : i32
        %21 = arith.index_cast %20 : i32 to index
        %c0_12 = arith.constant 0 : index
        %22 = vector.load %arg2[%21, %c0_12] : memref<16x128xf32, #tpu.memory_space<vmem>>, vector<8x128xf32>
        %23 = arith.index_cast %20 : i32 to index
        %c0_13 = arith.constant 0 : index
        %24 = vector.load %arg3[%23, %c0_13] : memref<16x128xf32, #tpu.memory_space<vmem>>, vector<8x128xf32>
        %25 = arith.subf %22, %24 : vector<8x128xf32>
        %26 = tpu.iota {dimensions = array<i32: 0>} : vector<8x128xi32>
        %27 = arith.subi %6, %20 : i32
        %28 = vector.broadcast %27 : i32 to vector<8x128xi32>
        %29 = arith.cmpi slt, %26, %28 : vector<8x128xi32>
        %30 = arith.mulf %25, %25 : vector<8x128xf32>
        %cst_14 = arith.constant 0.000000e+00 : f32
        %31 = vector.broadcast %cst_14 : f32 to vector<8x128xf32>
        %32 = arith.select %29, %30, %31 : vector<8x128xi1>, vector<8x128xf32>
        %33 = arith.addf %arg6, %32 : vector<8x128xf32>
        scf.yield %33 : vector<8x128xf32>
      }
      %c2_i32_8 = arith.constant 2 : i32
      %c0 = arith.constant 0 : index
      %c0_9 = arith.constant 0 : index
      %16 = vector.load %arg4[%c0, %c0_9] : memref<8x128xf32, #tpu.memory_space<vmem>>, vector<8x128xf32>
      %17 = arith.addf %16, %15 : vector<8x128xf32>
      %c0_10 = arith.constant 0 : index
      %c0_11 = arith.constant 0 : index
      %18 = vector.load %arg4[%c0_10, %c0_11] : memref<8x128xf32, #tpu.memory_space<vmem>>, vector<8x128xf32>
      tpu.vector_store %arg4[%c0_10, %c0_11], %17 {strides = array<i32>} : memref<8x128xf32, #tpu.memory_space<vmem>>, vector<8x128xf32>,
    } else {
    }
    return
  }
  func.func @transform_0(%arg0: i32, %arg1: i32) -> (i32, i32) {
    %c1_i32 = arith.constant 1 : i32
    %0 = arith.muli %arg0, %c1_i32 : i32
    %1 = arith.addi %0, %arg1 : i32
    %c0_i32 = arith.constant 0 : i32
    %2 = arith.minsi %1, %c0_i32 : i32
    %c0_i32_0 = arith.constant 0 : i32
    %c0_i32_1 = arith.constant 0 : i32
    return %2, %c0_i32_0 : i32, i32
  }
  func.func @transform_1(%arg0: i32, %arg1: i32) -> (i32, i32) {
    %c1_i32 = arith.constant 1 : i32
    %0 = arith.muli %arg0, %c1_i32 : i32
    %1 = arith.addi %0, %arg1 : i32
    %c0_i32 = arith.constant 0 : i32
    %2 = arith.minsi %1, %c0_i32 : i32
    %c0_i32_0 = arith.constant 0 : i32
    %c0_i32_1 = arith.constant 0 : i32
    return %2, %c0_i32_0 : i32, i32
  }
  func.func @transform_2(%arg0: i32, %arg1: i32) -> (i32, i32) {
    %c0_i32 = arith.constant 0 : i32
    %c0_i32_0 = arith.constant 0 : i32
    return %arg0, %c0_i32 : i32, i32
  }
}

</mosaic_0001>

<bundles_post_ra>
// kernel: tpu_custom_call.1
= control target key start
LH: loop header
LB: loop body
LE: loop exit
PB: predicated region body
PF: predicated region fallthrough
CT: control target
= control target key end

     0   :  { %7 = vsyncpa [#allocation3], 0  ;;  %s989_s0 = inlined_call_operand.hbm [shape: f32[16,128], index: 0, kind: input, shape index: {}]   ;;  %s990_s1 = inlined_call_operand.hbm [shape: f32[16,128], index: 1, kind: input, shape index: {}]   ;;  %s991_s2 = inlined_call_operand.hbm [shape: f32[16,128], index: 2, kind: output, shape index: {}]  }
   0x1   :  { %9 = vsyncpa [#allocation3 + $0x1], 0 }
   0x2   :  { %10 = vsyncpa [#allocation6], 0 }
   0x3   :  { %12 = vsyncpa [#allocation6 + $0x1], 0 }
   0x4   :  { %13 = vsyncpa [#allocation4], 0 }
   0x5   :  { %15 = vsyncpa [#allocation4 + $0x1], 0  ;;  %s764_s9 = smov 0   ;;  %s766_s10 = smov 0  }
   0x6   :  { %s768_s11 = smov 0   ;;  %s770_s12 = smov 0  }
   0x7   :  { %s772_s13 = smov 0   ;;  %s774_s14 = smov 0  }
   0x8   :  { %s776_s15 = smov 0   ;;  %s778_s16 = smov 0  }
   0x9 LB: > { %s422_s17 = sadd.s32 4294967295, %s733_s16   ;;  %s423_s18 = sadd.s32 4294967294, %s733_s16   ;;  %s733_s16 = sphi %s778_s16, %s21_s16   ;;  %s729_s15 = sphi %s776_s15, %s1010_s15   ;;  %s725_s14 = sphi %s774_s14, %s1009_s14   ;;  %s721_s13 = sphi %s772_s13, %s979_s13   ;;  %s717_s12 = sphi %s770_s12, %s1008_s12   ;;  %s713_s11 = sphi %s768_s11, %s1007_s11   ;;  %s709_s10 = sphi %s766_s10, %s1006_s10   ;;  %s705_s9 = sphi %s764_s9, %s1005_s9  }
   0xa   : > { %s33_s19 = sadd.s32 1, %s729_s15  ;;  %p702_p1 = scmp.ne.s32.totalorder %s721_s13, 0 }
   0xb   : > { %p35_p0 = scmp.ge.s32.totalorder %s33_s19, 2  ;;  %p54_p2 = scmp.eq.s32.totalorder %s733_s16, 0 }
   0xc   : > { %p59_p3 = scmp.ne.s32.totalorder %s721_s13, %s717_s12  ;;  %p60_p5 = scmp.eq.s32.totalorder %s422_s17, 0 }
   0xd   : > { %s1012_s19 = smov (%p35_p0, %s33_s19), 0  ;;  %p810_p4 = por %p702_p1, %p54_p2 }
   0xe   : > { %p814_p6 = por %p60_p5, %p59_p3  ;;  %s101_s22 = ssub.s32 %s729_s15, %s1012_s19 }
   0xf   : > { %p102_p7 = scmp.eq.s32.totalorder %s101_s22, 0  ;;  %s104_s23 = sadd.s32 1, %s713_s11 }
  0x10   : > { %s995_s21 = scalar_select %p814_p6, 1, 0 }
  0x11   : > { %s822_s24 = scalar_select %p102_p7, %s713_s11, %s104_s23  }
  0x12   : > { %p114_p8 = scmp.ne.s32.totalorder %s713_s11, %s709_s10  ;;  %p115_p9 = scmp.eq.s32.totalorder %s422_s17, 1 }
  0x13   : > { %p120_p10 = scmp.ne.s32.totalorder %s709_s10, %s705_s9  ;;  %p121_p11 = scmp.eq.s32.totalorder %s423_s18, 1 }
  0x14   : > { %p828_p12 = por %p115_p9, %p114_p8  ;;  %p465_p1 = scmp.lt.s32.totalorder %s733_s16, 2 }
  0x15   : > { %p833_p0 = por %p121_p11, %p120_p10  ;;  %s743_s27 = smov [#allocation2]  }
  0x16   : > { %s996_s25 = scalar_select %p828_p12, 1, 0 }
  0x17   : > { %s997_s26 = scalar_select %p833_p0, 1, 0 }
  0x18   : > { %s155_s28 = sshll.u32 %s743_s27, 4  ;;  %p840_p2 = pnand %p465_p1, %p810_p4  ;;  %s156_s28 = int_to_ptr.vmem [resolvable:$true] %s155_s28 }
  0x19   : > { %s558_s4 = scalar_lea.hbm %s989_s0, 256 }
  0x1a   : > { %p559_p3 = scmp.ne.s32.totalorder %s989_s0, %s558_s4  ;;  %p560_p5 = pneg %p840_p2 }
  0x1b   : > { %p565_p8 = scmp.lt.u32.totalorder %s558_s4, %s558_s4  ;;  %p567_p9 = scmp.lt.u32.totalorder %s558_s4, %s989_s0 }
  0x1c   : > { %p561_p7 = pnand %p560_p5, %p559_p3 }
  0x1d   : > { %p568_p10 = por %p567_p9, %p565_p8 }
  0x1e   : > { %p562_p4 = pneg %p561_p7 }
  0x20   : > { %p569_p11 = pnand %p568_p10, %p562_p4 }
  0x22   : > { %572 = shalt.err (!%p569_p11)
}
  0x23   : > { %s573_s12 = scalar_lea.vmem %s156_s28, 256  ;;  %s580_s17 = scalar_lea.vmem %s156_s28, 512 }
  0x24   : > { %p574_p1 = scmp.ne.s32.totalorder %s156_s28, %s573_s12  ;;  %p581_p12 = scmp.lt.s32.totalorder %s156_s28, %s156_s28 }
  0x25   : > { %p582_p6 = scmp.lt.s32.totalorder %s580_s17, %s573_s12 }
  0x26   : > { %p576_p13 = pnand %p574_p1, %p560_p5 }
  0x27   : > { %p583_p3 = por %p582_p6, %p581_p12 }
  0x28   : > { %p577_p0 = pneg %p576_p13 }
  0x2a   : > { %p584_p7 = pnand %p583_p3, %p577_p0 }
  0x2c   : > { %587 = shalt.err (!%p584_p7)
}
  0x2d   : > { %s744_s18 = smov 128   ;;  %s745_s20 = smov 8  }
  0x2e   : > { %457 = dma.hbm_to_vmem [thread:$0]  (!%p840_p2), %s989_s0, 256, %s156_s28, [#allocation3], %s744_s18, %s744_s18, %s745_s20  }
  0x2f   : > { %p432_p13 = scmp.ge.s32.totalorder %s733_s16, 1  ;;  %p187_p4 = scmp.lt.s32.totalorder %s733_s16, 3 }
  0x30   : > { %s746_s30 = smov [#allocation5]   ;;  %s588_s6 = scalar_lea.hbm %s990_s1, 256 }
  0x31   : > { %p871_p8 = pnand %p432_p13, %p187_p4  ;;  %s179_s3 = sshll.u32 %s746_s30, 4  ;;  %s180_s3 = int_to_ptr.vmem [resolvable:$true] %s179_s3 }
  0x32   : > { %p589_p6 = scmp.ne.s32.totalorder %s990_s1, %s588_s6  ;;  %p595_p9 = scmp.lt.u32.totalorder %s588_s6, %s588_s6 }
  0x33   : > { %s999_s27 = scalar_select %p871_p8, 1, 0 }
  0x34   : > { %p591_p12 = pnand %p589_p6, %p560_p5  ;;  %p597_p10 = scmp.lt.u32.totalorder %s588_s6, %s990_s1 }
  0x36   : > { %p592_p0 = pneg %p591_p12  ;;  %p598_p11 = por %p597_p10, %p595_p9 }
  0x38   : > { %p599_p1 = pnand %p598_p11, %p592_p0 }
  0x3a   : > { %602 = shalt.err (!%p599_p1)
}
  0x3b   : > { %s603_s17 = scalar_lea.vmem %s180_s3, 256  ;;  %s610_s22 = scalar_lea.vmem %s180_s3, 512 }
  0x3c   : > { %p604_p3 = scmp.ne.s32.totalorder %s180_s3, %s603_s17  ;;  %p611_p4 = scmp.lt.s32.totalorder %s180_s3, %s180_s3 }
  0x3d   : > { %p612_p8 = scmp.lt.s32.totalorder %s610_s22, %s603_s17 }
  0x3e   : > { %p606_p7 = pnand %p604_p3, %p560_p5 }
  0x3f   : > { %p613_p6 = por %p612_p8, %p611_p4 }
  0x40   : > { %p607_p13 = pneg %p606_p7 }
  0x42   : > { %p614_p12 = pnand %p613_p6, %p607_p13 }
  0x44   : > { %617 = shalt.err (!%p614_p12)
}
  0x45   : > { %460 = dma.hbm_to_vmem [thread:$0]  (!%p840_p2), %s990_s1, 256, %s180_s3, [#allocation6], %s744_s18, %s744_s18, %s745_s20  }
  0x46   : > { %p1000_p0 = scmp.ne.s32.totalorder %s999_s27, 0 }
  0x47   : > { %s193_s4 = sand.u32 (!%p1000_p0), 1, %s721_s13   ;;  %p1001_p5 = scmp.ne.s32.totalorder (!%p1000_p0), %s995_s21, 0 }
  0x48   : > { %191 = sbr.rel (%p1000_p0) target bundleno = 144 (0x90), region = 28  ;;  %s433_s5 = sshll.u32 (!%p1000_p0), %s193_s4, 4 }
  0x49   : > { %s194_s6 = scalar_lea.sflag (!%p1000_p0), [#allocation3], %s193_s4  ;;  %s901_s7 = scalar_lea.vmem (!%p1000_p0), [#allocation2], %s433_s5 }
  0x4f   : > { %691 = dma.done.wait (%p1001_p5), %s194_s6, 256  }
  0x50   : > { %693 = vsyncadd (%p1001_p5), %s194_s6, 4294967040  ;;  %s203_s29 = scalar_lea.sflag [#allocation6], %s193_s4  ;;  %s907_s8 = scalar_lea.vmem [#allocation5], %s433_s5 }
  0x51   : > { %695 = dma.done.wait (%p1001_p5), %s203_s29, 256  }
  0x52   : > { %697 = vsyncadd (%p1001_p5), %s203_s29, 4294967040  ;;  %s229_s18 = sand.u32 1, %s709_s10   ;;  %s436_s20 = sshll.u32 %s725_s14, 4  ;;  %v747_v0 = vmov 0.0  }
  0x53   : > { %s435_s27 = sshll.u32 %s229_s18, 3  ;;  %s917_s3 = ssub.s32 16, %s436_s20 }
  0x54   : > { %s919_s28 = scalar_lea.vmem [#allocation7], %s435_s27  ;;  %p437_p2 = scmp.lt.s32.totalorder %s917_s3, 16 }
  0x55   : > { %244 = vst [vmem:[%s919_s28] sm:$0xff] %v747_v0  ;;  %v252_v1 = vld [vmem:[%s901_s7] sm:$0xff] (!%p437_p2)  ;;  %v438_v3 = vld [vmem:[%s901_s7 + $0x8] sm:$0xff] (!%p437_p2) }
  0x56   : > { %251 = sbr.rel (%p437_p2) target bundleno = 96 (0x60), region = 44  ;;  %v253_v2 = vld [vmem:[%s907_s8] sm:$0xff] (!%p437_p2)  ;;  %v439_v5 = vld [vmem:[%s907_s8 + $0x8] sm:$0xff] (!%p437_p2) }
  0x57   : > { %v254_v4 = vsub.f32 (!%p437_p2), %v252_v1, %v253_v2  ;;  %v261_v6 = vsub.f32 (!%p437_p2), %v438_v3, %v439_v5 }
  0x59   : > { %v255_v7 = vmul.f32 (!%p437_p2), %v254_v4, %v254_v4  ;;  %v262_v8 = vmul.f32 (!%p437_p2), %v261_v6, %v261_v6 }
  0x5b   : > { %v263_v10 = vadd.f32 (!%p437_p2), %v262_v8, %v255_v7 }
  0x5c   : > { %v264_v9 = vld [vmem:[%s919_s28] sm:$0xff] (!%p437_p2) }
  0x5d   : > { %v265_v11 = vadd.f32 %v264_v9, %v263_v10 }
  0x5f   : > { %266 = vst [vmem:[%s919_s28] sm:$0xff] %v265_v11 }
  0x60 PF: > { %p440_p8 = scmp.ge.s32.totalorder %s917_s3, 16 }
  0x61   : > { %v735_v12 = vmov (!%p440_p8), 0.0   ;;  %s739_s21 = smov (!%p440_p8), 0  }
  0x62   : > { %270 = sbr.rel (%p440_p8) target bundleno = 119 (0x77), region = 48 }
  0x69 LB: >> { %v284_v13 = vlaneseq  ;;  %s441_s12 = sshll.u32 %s741_s21, 3  ;;  %s276_s21 = sadd.s32 1, %s741_s21   ;;  %s741_s21 = sphi %s739_s21, %s276_s21   ;;  %v737_v12 = vphi %v735_v12, %v736_v12  }
  0x6a   : >> { %s279_s17 = scalar_lea.vmem %s901_s7, %s441_s12 [#allocation2]  ;;  %s281_s22 = scalar_lea.vmem %s907_s8, %s441_s12 [#allocation5] }
  0x6b   : >> { %v285_v14 = vshrl.u32 %v284_v13, 7  ;;  %v280_v15 = vld [vmem:[%s279_s17] sm:$0xff]  ;;  %s286_s23 = ssub.s32 %s917_s3, %s441_s12  ;;  %p273_p9 = scmp.ge.s32.totalorder %s276_s21, 2  }
  0x6c   : >> { %v282_v16 = vld [vmem:[%s281_s22] sm:$0xff]  ;;  %v287_v18 = vstv %s286_s23 }
  0x6d   : >> { %v283_v17 = vsub.f32 %v280_v15, %v282_v16  ;;  %vm288_vm0 = vcmp.lt.s32.totalorder %v285_v14, %v287_v18  ;;  %v292_v22 = vld [vmem:[%s919_s28] sm:$0xff] (%p273_p9) }
  0x6e   : > { %275 = sbr.rel (!%p273_p9) target bundleno = 105 (0x69), region = 109 }
  0x6f   : >> { %v289_v19 = vmul.f32 %v283_v17, %v283_v17 }
  0x71   : >> { %v290_v20 = vsel %vm288_vm0, %v289_v19, 0.0 }
  0x72   : >> { %v291_v21 = vadd.f32 %v737_v12, %v290_v20  }
  0x74   : >> { %v736_v12 = vmov %v291_v21   ;;  %v293_v23 = vadd.f32 (%p273_p9), %v292_v22, %v291_v21 }
  0x76   : > { %294 = vst [vmem:[%s919_s28] sm:$0xff] %v293_v23 }
  0x77 PF: > { %s443_s30 = sshll.u32 %s725_s14, 7  ;;  %s309_s29 = sshll.u32 %s919_s28, 4  ;;  %s310_s29 = int_to_ptr.vmem [resolvable:$true] %s309_s29 }
  0x78   : > { %s939_s6 = scalar_lea.hbm %s991_s2, %s443_s30  ;;  %s296_s20 = scalar_lea.sflag [#allocation4], %s229_s18 }
  0x79   : > { %s618_s7 = scalar_lea.vmem %s310_s29, 128  ;;  %p1002_p11 = scmp.ne.s32.totalorder %s996_s25, 0 }
  0x7a   : > { %p619_p10 = scmp.ne.s32.totalorder %s310_s29, %s618_s7  ;;  %s748_s8 = smov [#allocation7]  }
  0x7b   : > { %s622_s27 = sshll.u32 %s748_s8, 4  ;;  %s623_s27 = int_to_ptr.vmem [resolvable:$false] %s622_s27 }
  0x7c   : > { %p620_p1 = pnand %p619_p10, %p1002_p11  ;;  %s624_s3 = scalar_lea.vmem %s623_s27, 256 }
  0x7d   : > { %p625_p7 = scmp.lt.s32.totalorder %s310_s29, %s623_s27  ;;  %p626_p13 = scmp.lt.s32.totalorder %s624_s3, %s618_s7 }
  0x7e   : > { %p621_p3 = pneg %p620_p1 }
  0x7f   : > { %p627_p4 = por %p626_p13, %p625_p7 }
  0x81   : > { %p628_p6 = pnand %p627_p4, %p621_p3 }
  0x83   : > { %631 = shalt.err (!%p628_p6)
}
  0x84   : > { %s632_s14 = scalar_lea.hbm %s939_s6, 128  ;;  %s636_s21 = scalar_lea.hbm %s991_s2, 256 }
  0x85   : > { %p633_p12 = scmp.ne.s32.totalorder %s939_s6, %s632_s14  ;;  %p637_p2 = scmp.lt.u32.totalorder %s939_s6, %s991_s2 }
  0x86   : > { %p638_p8 = scmp.lt.u32.totalorder %s636_s21, %s632_s14  ;;  %p640_p10 = scmp.lt.u32.totalorder %s632_s14, %s939_s6 }
  0x87   : > { %p634_p0 = pnand %p633_p12, %p1002_p11 }
  0x88   : > { %p639_p9 = por %p638_p8, %p637_p2 }
  0x89   : > { %p635_p5 = pneg %p634_p0 }
  0x8a   : > { %p641_p1 = por %p640_p10, %p639_p9 }
  0x8c   : > { %p642_p3 = pnand %p641_p1, %p635_p5 }
  0x8e   : > { %645 = shalt.err (!%p642_p3)
}
  0x8f   : > { %452 = dma.vmem_to_hbm [thread:$0]  (%p1002_p11), %s310_s29, 128, %s939_s6, %s296_s20  }
  0x90 PF: > { %s321_s22 = sand.u32 1, %s705_s9   ;;  %p1003_p7 = scmp.ne.s32.totalorder %s997_s26, 0 }
  0x91   : > { %p1004_p13 = scmp.ge.s32.totalorder %s733_s16, 2  ;;  %s322_s23 = scalar_lea.sflag [#allocation4], %s321_s22 }
  0x93   : > { %p462_p4 = pnand %p1004_p13, %p1003_p7 }
  0x95   : > { %699 = dma.done.wait (!%p462_p4), %s322_s23, 128  }
  0x96   : > { %701 = vsyncadd (!%p462_p4), %s322_s23, 4294967168  ;;  %s21_s16 = sadd.s32 1, %s733_s16   ;;  %s1005_s9 = smov %s709_s10 }
  0x97   : > { %p18_p6 = scmp.ge.s32.totalorder %s21_s16, 4   ;;  %s1006_s10 = smov %s713_s11 }
  0x98   : > { %s1007_s11 = smov %s822_s24  ;;  %s1008_s12 = smov %s721_s13 }
  0x99   : > { %s979_s13 = smov 0   ;;  %s1009_s14 = smov %s729_s15 }
  0x9a   : > { %s1010_s15 = smov %s1012_s19  ;;  %20 = sbr.rel (!%p18_p6) target bundleno = 9 (0x9), region = 120 }
  0xa1   :  { %327 = vsyncpa [#allocation3], 1 }
  0xa2   :  { %329 = vsyncpa [#allocation3 + $0x1], 1 }
  0xa3   :  { %330 = vsyncpa [#allocation6], 1 }
  0xa4   :  { %332 = vsyncpa [#allocation6 + $0x1], 1 }
  0xa5   :  { %333 = vsyncpa [#allocation4], 1 }
  0xa6   :  { %335 = vsyncpa [#allocation4 + $0x1], 1 }

</bundles_post_ra>
